<compile_context>
chip_gen: v6e
topology: v6e:2x2x1
jax: 0.10.0
libtpu: 0.0.40
codegen_flags: <defaults>
</compile_context>

<pallas_src>
import jax
import jax.numpy as jnp
from jax.experimental import pallas as pl
from jax.experimental.pallas import tpu as pltpu

_LANE = 128


def _round_up(a, b):
    return ((a + b - 1) // b) * b


def _make_kernel(hw_true, thw, needs_mask):
    """Build the kernel closure for a given true HW, HW-tile size, pad-mask flag."""
    n_chunks = thw // _LANE
    inv_hw = 1.0 / float(hw_true)

    def kernel(x_ref, w1_ref, w2t_ref, o_ref, max_acc, sum_acc):
        # x_ref:   (1, C, THW) tile in the input's native dtype
        # w1_ref:  (Cr, C) f32     w2t_ref: (Cr, C) f32  (= w2.T)
        # o_ref:   (1, 1, C) f32 (lane-dense output)
        # max_acc / sum_acc: (C, 128) f32 VMEM scratch (persist across HW tiles)
        hw_id = pl.program_id(1)

        @pl.when(hw_id == 0)
        def _init():
            max_acc[...] = jnp.full(max_acc.shape, -jnp.inf, dtype=max_acc.dtype)
            sum_acc[...] = jnp.zeros(sum_acc.shape, dtype=sum_acc.dtype)

        # Chunked element-wise accumulation on the VPU: one (C, 128) chunk at a
        # time, upcast to f32 at load.  Padding lanes (zeros) are masked to -inf
        # for the max; zeros are harmless for the sum.
        for j in range(n_chunks):
            chunk = x_ref[0, :, j * _LANE:(j + 1) * _LANE].astype(jnp.float32)
            if needs_mask:
                lane = jax.lax.broadcasted_iota(jnp.int32, chunk.shape, 1)
                gidx = lane + (hw_id * thw + j * _LANE)
                chunk_max = jnp.where(gidx < hw_true, chunk, -jnp.inf)
            else:
                chunk_max = chunk
            max_acc[...] = jnp.maximum(max_acc[...], chunk_max)
            sum_acc[...] = sum_acc[...] + chunk

        @pl.when(hw_id == pl.num_programs(1) - 1)
        def _finalize():
            # Single cross-lane reduce of the accumulators -> pooled stats.
            mx = jnp.max(max_acc[...], axis=-1, keepdims=True)             # (C, 1)
            av = jnp.sum(sum_acc[...], axis=-1, keepdims=True) * inv_hw    # (C, 1)
            v = jnp.concatenate([mx, av], axis=1)                          # (C, 2)
            # Batched FC: both pooled vectors share the two matmuls.
            h = jnp.dot(w1_ref[...], v, preferred_element_type=jnp.float32)    # (Cr, 2)
            h = jnp.maximum(h, 0.0)
            y = jnp.dot(h.T, w2t_ref[...], preferred_element_type=jnp.float32)  # (2, C)
            y = y[0:1, :] + y[1:2, :]                                      # (1, C)
            o_ref[0] = jax.nn.sigmoid(y).astype(o_ref.dtype)

    return kernel


def channel_attention(x_nchw, w1, w2, *, max_lanes_per_tile=1024):
    """Channel attention gate.

    x_nchw: (N, C, H, W) any float dtype (streamed natively, f32 accumulation)
    w1:     (C//r, C) f32   (first 1x1 conv, no bias)
    w2:     (C, C//r) f32   (second 1x1 conv, no bias)
    returns (N, C, 1, 1) f32 sigmoid gate.
    """
    N, C, H, W = x_nchw.shape
    HW = H * W
    Cr = w1.shape[0]

    # HW tiling: lane tile must be a multiple of 128; cap it for VMEM safety.
    hw_r = _round_up(HW, _LANE)
    thw = min(_round_up(max_lanes_per_tile, _LANE), hw_r)
    hw_p = _round_up(hw_r, thw)
    n_hw = hw_p // thw

    x = x_nchw.reshape(N, C, HW)              # free reshape, no dtype cast
    if hw_p != HW:
        x = jnp.pad(x, ((0, 0), (0, 0), (0, hw_p - HW)))   # zero pad last tile
    w2t = jnp.transpose(w2)                   # (Cr, C); tiny, one-time

    kernel = _make_kernel(HW, thw, hw_p != HW)

    bytes_accessed = int(N * C * hw_p * x.dtype.itemsize
                         + (w1.size + w2.size) * jnp.dtype(w1.dtype).itemsize
                         + N * C * 4)
    cost = pl.CostEstimate(
        flops=int(2 * N * C * HW + 8 * N * C * Cr),
        transcendentals=int(N * C),
        bytes_accessed=bytes_accessed,
    )

    out = pl.pallas_call(
        kernel,
        out_shape=jax.ShapeDtypeStruct((N, 1, C), jnp.float32),
        grid_spec=pltpu.PrefetchScalarGridSpec(
            num_scalar_prefetch=0,
            grid=(N, n_hw),
            in_specs=[
                pl.BlockSpec((1, C, thw), lambda n, h: (n, 0, h)),
                pl.BlockSpec((Cr, C), lambda n, h: (0, 0)),
                pl.BlockSpec((Cr, C), lambda n, h: (0, 0)),
            ],
            out_specs=pl.BlockSpec((1, 1, C), lambda n, h: (n, 0, 0)),
            scratch_shapes=[
                pltpu.VMEM((C, _LANE), jnp.float32),   # running max
                pltpu.VMEM((C, _LANE), jnp.float32),   # running sum
            ],
        ),
        compiler_params=pltpu.CompilerParams(
            dimension_semantics=("parallel", "arbitrary"),
        ),
        cost_estimate=cost,
    )(x, w1, w2t)

    return out.reshape(N, C, 1, 1)


def make_params(key, in_channel, reduction):
    """Deterministic Kaiming-normal (fan_in, relu) init for the two 1x1 convs."""
    cr = in_channel // reduction
    k1, k2 = jax.random.split(key)
    std1 = (2.0 / in_channel) ** 0.5
    std2 = (2.0 / cr) ** 0.5
    w1 = std1 * jax.random.normal(k1, (cr, in_channel), dtype=jnp.float32)
    w2 = std2 * jax.random.normal(k2, (in_channel, cr), dtype=jnp.float32)
    return w1, w2


def reference(x_nchw, w1, w2):
    """Plain-JAX reference for correctness checking."""
    mx = jnp.max(x_nchw, axis=(2, 3))       # (N, C)
    av = jnp.mean(x_nchw, axis=(2, 3))      # (N, C)

    def fc(v):                              # v: (N, C)
        h = jnp.maximum(v @ w1.T, 0.0)      # (N, Cr)
        return h @ w2.T                     # (N, C)

    y = jax.nn.sigmoid(fc(mx) + fc(av))
    N, C = y.shape
    return y.reshape(N, C, 1, 1)


if __name__ == "__main__":
    N, C, H, W = 2, 4, 16, 16
    reduction = 2

    key = jax.random.PRNGKey(0)
    kx, kp, kx2 = jax.random.split(key, 3)
    x = jax.random.normal(kx, (N, C, H, W), dtype=jnp.float32)
    w1, w2 = make_params(kp, C, reduction)

    # f32 path
    out = jax.block_until_ready(channel_attention(x, w1, w2))
    ref = reference(x, w1, w2)
    assert out.shape == (N, C, 1, 1)
    assert jnp.allclose(out, ref, atol=1e-5, rtol=1e-5), "f32 mismatch vs reference"

    # bf16 native-dtype streaming path (f32 accumulation in-kernel)
    x_bf = x.astype(jnp.bfloat16)
    out_bf = jax.block_until_ready(channel_attention(x_bf, w1, w2))
    ref_bf = reference(x_bf.astype(jnp.float32), w1, w2)
    assert jnp.allclose(out_bf, ref_bf, atol=1e-4, rtol=1e-4), "bf16 mismatch vs reference"

    # Non-128-multiple HW with multiple HW tiles (exercises padding mask +
    # cross-tile scratch accumulation).
    x2 = jax.random.normal(kx2, (N, C, 20, 20), dtype=jnp.float32)
    out2 = jax.block_until_ready(channel_attention(x2, w1, w2, max_lanes_per_tile=128))
    ref2 = reference(x2, w1, w2)
    assert jnp.allclose(out2, ref2, atol=1e-5, rtol=1e-5), "tiled/masked mismatch vs reference"

    print("KERNEL_OK")
</pallas_src>

<mosaic_0001>
module attributes {stable_mosaic.version = 11 : i64} {
  func.func @kernel(%arg0: i32, %arg1: i32, %arg2: memref<1x4x256xf32, #tpu.memory_space<vmem>>, %arg3: memref<2x4xf32, #tpu.memory_space<vmem>>, %arg4: memref<2x4xf32, #tpu.memory_space<vmem>>, %arg5: memref<1x1x4xf32, #tpu.memory_space<vmem>>, %arg6: memref<4x128xf32, #tpu.memory_space<vmem>>, %arg7: memref<4x128xf32, #tpu.memory_space<vmem>>) attributes {dimension_semantics = [#tpu.dimension_semantics<parallel>, #tpu.dimension_semantics<arbitrary>], iteration_bounds = array<i64: 2, 1>, scalar_prefetch = 0 : i64, scratch_operands = 2 : i64, tpu.core_type = #tpu.core_type<tc>, window_params = [{transform_indices = @transform_0, window_bounds = array<i64: 1, 4, 256>}, {pipeline_mode = #tpu.pipeline_mode<synchronous>, transform_indices = @transform_1, window_bounds = array<i64: 2, 4>}, {pipeline_mode = #tpu.pipeline_mode<synchronous>, transform_indices = @transform_2, window_bounds = array<i64: 2, 4>}, {transform_indices = @transform_3, window_bounds = array<i64: 1, 1, 4>}]} {
    %c0_i32 = arith.constant 0 : i32
    %0 = arith.cmpi eq, %arg1, %c0_i32 : i32
    %1 = arith.extui %0 : i1 to i32
    %c0_i32_0 = arith.constant 0 : i32
    %2 = arith.cmpi ne, %1, %c0_i32_0 : i32
    scf.if %2 {
      %cst = arith.constant 0xFF800000 : f32
      %22 = vector.broadcast %cst : f32 to vector<4x128xf32>
      %c0_23 = arith.constant 0 : index
      %c0_24 = arith.constant 0 : index
      %23 = vector.load %arg6[%c0_23, %c0_24] : memref<4x128xf32, #tpu.memory_space<vmem>>, vector<4x128xf32>
      tpu.vector_store %arg6[%c0_23, %c0_24], %22 {strides = array<i32>} : memref<4x128xf32, #tpu.memory_space<vmem>>, vector<4x128xf32>,
      %cst_25 = arith.constant 0.000000e+00 : f32
      %24 = vector.broadcast %cst_25 : f32 to vector<4x128xf32>
      %c0_26 = arith.constant 0 : index
      %c0_27 = arith.constant 0 : index
      %25 = vector.load %arg7[%c0_26, %c0_27] : memref<4x128xf32, #tpu.memory_space<vmem>>, vector<4x128xf32>
      tpu.vector_store %arg7[%c0_26, %c0_27], %24 {strides = array<i32>} : memref<4x128xf32, #tpu.memory_space<vmem>>, vector<4x128xf32>,
    } else {
    }
    %c0 = arith.constant 0 : index
    %c0_1 = arith.constant 0 : index
    %c0_2 = arith.constant 0 : index
    %3 = vector.load %arg2[%c0, %c0_1, %c0_2] : memref<1x4x256xf32, #tpu.memory_space<vmem>>, vector<1x4x128xf32>
    %4 = vector.shape_cast %3 : vector<1x4x128xf32> to vector<4x128xf32>
    %c0_3 = arith.constant 0 : index
    %c0_4 = arith.constant 0 : index
    %5 = vector.load %arg6[%c0_3, %c0_4] : memref<4x128xf32, #tpu.memory_space<vmem>>, vector<4x128xf32>
    %6 = arith.maximumf %5, %4 : vector<4x128xf32>
    %c0_5 = arith.constant 0 : index
    %c0_6 = arith.constant 0 : index
    %7 = vector.load %arg6[%c0_5, %c0_6] : memref<4x128xf32, #tpu.memory_space<vmem>>, vector<4x128xf32>
    tpu.vector_store %arg6[%c0_5, %c0_6], %6 {strides = array<i32>} : memref<4x128xf32, #tpu.memory_space<vmem>>, vector<4x128xf32>,
    %c0_7 = arith.constant 0 : index
    %c0_8 = arith.constant 0 : index
    %8 = vector.load %arg7[%c0_7, %c0_8] : memref<4x128xf32, #tpu.memory_space<vmem>>, vector<4x128xf32>
    %9 = arith.addf %8, %4 : vector<4x128xf32>
    %c0_9 = arith.constant 0 : index
    %c0_10 = arith.constant 0 : index
    %10 = vector.load %arg7[%c0_9, %c0_10] : memref<4x128xf32, #tpu.memory_space<vmem>>, vector<4x128xf32>
    tpu.vector_store %arg7[%c0_9, %c0_10], %9 {strides = array<i32>} : memref<4x128xf32, #tpu.memory_space<vmem>>, vector<4x128xf32>,
    %c0_11 = arith.constant 0 : index
    %c0_12 = arith.constant 0 : index
    %c128 = arith.constant 128 : index
    %11 = vector.load %arg2[%c0_11, %c0_12, %c128] : memref<1x4x256xf32, #tpu.memory_space<vmem>>, vector<1x4x128xf32>
    %12 = vector.shape_cast %11 : vector<1x4x128xf32> to vector<4x128xf32>
    %c0_13 = arith.constant 0 : index
    %c0_14 = arith.constant 0 : index
    %13 = vector.load %arg6[%c0_13, %c0_14] : memref<4x128xf32, #tpu.memory_space<vmem>>, vector<4x128xf32>
    %14 = arith.maximumf %13, %12 : vector<4x128xf32>
    %c0_15 = arith.constant 0 : index
    %c0_16 = arith.constant 0 : index
    %15 = vector.load %arg6[%c0_15, %c0_16] : memref<4x128xf32, #tpu.memory_space<vmem>>, vector<4x128xf32>
    tpu.vector_store %arg6[%c0_15, %c0_16], %14 {strides = array<i32>} : memref<4x128xf32, #tpu.memory_space<vmem>>, vector<4x128xf32>,
    %c0_17 = arith.constant 0 : index
    %c0_18 = arith.constant 0 : index
    %16 = vector.load %arg7[%c0_17, %c0_18] : memref<4x128xf32, #tpu.memory_space<vmem>>, vector<4x128xf32>
    %17 = arith.addf %16, %12 : vector<4x128xf32>
    %c0_19 = arith.constant 0 : index
    %c0_20 = arith.constant 0 : index
    %18 = vector.load %arg7[%c0_19, %c0_20] : memref<4x128xf32, #tpu.memory_space<vmem>>, vector<4x128xf32>
    tpu.vector_store %arg7[%c0_19, %c0_20], %17 {strides = array<i32>} : memref<4x128xf32, #tpu.memory_space<vmem>>, vector<4x128xf32>,
    %c0_i32_21 = arith.constant 0 : i32
    %19 = arith.cmpi eq, %arg1, %c0_i32_21 : i32
    %20 = arith.extui %19 : i1 to i32
    %c0_i32_22 = arith.constant 0 : i32
    %21 = arith.cmpi ne, %20, %c0_i32_22 : i32
    scf.if %21 {
      %c0_23 = arith.constant 0 : index
      %c0_24 = arith.constant 0 : index
      %22 = vector.load %arg6[%c0_23, %c0_24] : memref<4x128xf32, #tpu.memory_space<vmem>>, vector<4x128xf32>
      %cst = arith.constant dense<0xFF800000> : vector<4xf32>
      %23 = vector.multi_reduction <maximumf>, %22, %cst [1] : vector<4x128xf32> to vector<4xf32>
      %24 = vector.shape_cast %23 : vector<4xf32> to vector<4x1xf32>
      %c0_25 = arith.constant 0 : index
      %c0_26 = arith.constant 0 : index
      %25 = vector.load %arg7[%c0_25, %c0_26] : memref<4x128xf32, #tpu.memory_space<vmem>>, vector<4x128xf32>
      %cst_27 = arith.constant dense<0.000000e+00> : vector<4xf32>
      %26 = vector.multi_reduction <add>, %25, %cst_27 [1] : vector<4x128xf32> to vector<4xf32>
      %27 = vector.shape_cast %26 : vector<4xf32> to vector<4x1xf32>
      %cst_28 = arith.constant 3.906250e-03 : f32
      %28 = vector.broadcast %cst_28 : f32 to vector<4x1xf32>
      %29 = arith.mulf %27, %28 : vector<4x1xf32>
      %30 = tpu.concatenate %24, %29 in 1 : vector<4x1xf32>, vector<4x1xf32> -> vector<4x2xf32>
      %c0_29 = arith.constant 0 : index
      %c0_30 = arith.constant 0 : index
      %31 = vector.load %arg3[%c0_29, %c0_30] : memref<2x4xf32, #tpu.memory_space<vmem>>, vector<2x4xf32>
      %cst_31 = arith.constant dense<0.000000e+00> : vector<2x2xf32>
      %32 = tpu.matmul %31, %30, %cst_31 {dimension_numbers = #tpu.dot_dimension_numbers<[1], [0], [0], [1], [0, 0, 1, 1], [], []>} : vector<2x4xf32>, vector<4x2xf32>, vector<2x2xf32> -> vector<2x2xf32>
      %cst_32 = arith.constant 0.000000e+00 : f32
      %33 = vector.broadcast %cst_32 : f32 to vector<2x2xf32>
      %34 = arith.maximumf %32, %33 : vector<2x2xf32>
      %35 = tpu.transpose %34, [1, 0] : vector<2x2xf32> -> vector<2x2xf32>
      %c0_33 = arith.constant 0 : index
      %c0_34 = arith.constant 0 : index
      %36 = vector.load %arg4[%c0_33, %c0_34] : memref<2x4xf32, #tpu.memory_space<vmem>>, vector<2x4xf32>
      %cst_35 = arith.constant dense<0.000000e+00> : vector<2x4xf32>
      %37 = tpu.matmul %35, %36, %cst_35 {dimension_numbers = #tpu.dot_dimension_numbers<[1], [0], [0], [1], [0, 0, 1, 1], [], []>} : vector<2x2xf32>, vector<2x4xf32>, vector<2x4xf32> -> vector<2x4xf32>
      %38 = vector.extract_strided_slice %37 {offsets = [0, 0], sizes = [1, 4], strides = [1, 1]} : vector<2x4xf32> to vector<1x4xf32>
      %39 = vector.extract_strided_slice %37 {offsets = [1, 0], sizes = [1, 4], strides = [1, 1]} : vector<2x4xf32> to vector<1x4xf32>
      %40 = arith.addf %38, %39 : vector<1x4xf32>
      %41 = arith.negf %40 : vector<1x4xf32>
      %42 = math.exp %41 : vector<1x4xf32>
      %cst_36 = arith.constant 1.000000e+00 : f32
      %43 = vector.broadcast %cst_36 : f32 to vector<1x4xf32>
      %44 = arith.addf %43, %42 : vector<1x4xf32>
      %45 = arith.divf %43, %44 : vector<1x4xf32>
      %c0_37 = arith.constant 0 : index
      %c0_38 = arith.constant 0 : index
      %c0_39 = arith.constant 0 : index
      %46 = vector.load %arg5[%c0_37, %c0_38, %c0_39] : memref<1x1x4xf32, #tpu.memory_space<vmem>>, vector<1x1x4xf32>
      %47 = vector.shape_cast %46 : vector<1x1x4xf32> to vector<1x4xf32>
      %48 = vector.shape_cast %45 : vector<1x4xf32> to vector<1x1x4xf32>
      tpu.vector_store %arg5[%c0_37, %c0_38, %c0_39], %48 {strides = array<i32>} : memref<1x1x4xf32, #tpu.memory_space<vmem>>, vector<1x1x4xf32>,
    } else {
    }
    return
  }
  func.func @transform_0(%arg0: i32, %arg1: i32) -> (i32, i32, i32) {
    %c0_i32 = arith.constant 0 : i32
    %c0_i32_0 = arith.constant 0 : i32
    return %arg0, %c0_i32, %arg1 : i32, i32, i32
  }
  func.func @transform_1(%arg0: i32, %arg1: i32) -> (i32, i32) {
    %c0_i32 = arith.constant 0 : i32
    %c0_i32_0 = arith.constant 0 : i32
    %c0_i32_1 = arith.constant 0 : i32
    return %c0_i32, %c0_i32_0 : i32, i32
  }
  func.func @transform_2(%arg0: i32, %arg1: i32) -> (i32, i32) {
    %c0_i32 = arith.constant 0 : i32
    %c0_i32_0 = arith.constant 0 : i32
    %c0_i32_1 = arith.constant 0 : i32
    return %c0_i32, %c0_i32_0 : i32, i32
  }
  func.func @transform_3(%arg0: i32, %arg1: i32) -> (i32, i32, i32) {
    %c0_i32 = arith.constant 0 : i32
    %c0_i32_0 = arith.constant 0 : i32
    %c0_i32_1 = arith.constant 0 : i32
    return %arg0, %c0_i32, %c0_i32_0 : i32, i32, i32
  }
}

</mosaic_0001>

<bundles_post_ra>
// kernel: tpu_custom_call.1
= control target key start
LH: loop header
LB: loop body
LE: loop exit
PB: predicated region body
PF: predicated region fallthrough
CT: control target
= control target key end

     0   :  { %8 = vsyncpa [#allocation5], 0  ;;  %s1007_s0 = inlined_call_operand.hbm [shape: f32[2,4,256], index: 0, kind: input, shape index: {}]   ;;  %s1008_s1 = inlined_call_operand.hbm [shape: f32[2,4], index: 1, kind: input, shape index: {}]   ;;  %s1009_s2 = inlined_call_operand.vmem [shape: f32[2,4], index: 2, kind: input, shape index: {}]   ;;  %s1010_s3 = inlined_call_operand.hbm [shape: f32[2,1,4], index: 3, kind: output, shape index: {}]  }
   0x1   :  { %10 = vsyncpa [#allocation5 + $0x1], 0 }
   0x2   :  { %11 = vsyncpa [#allocation8], 0 }
   0x3   :  { %12 = vsyncpa [#allocation6], 0 }
   0x4   :  { %14 = vsyncpa [#allocation6 + $0x1], 0  ;;  %s833_s12 = smov 0   ;;  %s835_s13 = smov 0  }
   0x5   :  { %s837_s14 = smov 0   ;;  %s839_s15 = smov 0  }
   0x6   :  { %s841_s16 = smov 0   ;;  %s843_s17 = smov 0  }
   0x7 LB: > { %s553_s18 = sadd.s32 4294967295, %s805_s17   ;;  %s554_s19 = sadd.s32 4294967294, %s805_s17   ;;  %s805_s17 = sphi %s843_s17, %s20_s17   ;;  %s801_s16 = sphi %s841_s16, %s1027_s16   ;;  %s797_s15 = sphi %s839_s15, %s1026_s15   ;;  %s793_s14 = sphi %s837_s14, %s1025_s14   ;;  %s789_s13 = sphi %s835_s13, %s1024_s13   ;;  %s785_s12 = sphi %s833_s12, %s1023_s12  }
   0x8   : > { %p54_p0 = scmp.ne.s32.totalorder %s789_s13, %s785_s12  ;;  %p867_p1 = scmp.eq.s32.totalorder %s553_s18, 0 }
   0x9   : > { %p871_p2 = scmp.eq.s32.totalorder %s553_s18, 1  ;;  %p126_p3 = scmp.eq.s32.totalorder %s554_s19, 1 }
   0xa   : > { %p877_p4 = por %p867_p1, %p54_p0  ;;  %p555_p5 = scmp.ge.s32.totalorder %s805_s17, 1 }
   0xb   : > { %p882_p6 = por %p126_p3, %p54_p0  ;;  %p133_p7 = scmp.lt.s32.totalorder %s805_s17, 3 }
   0xc   : > { %s1014_s22 = scalar_select %p877_p4, 1, 0 }
   0xd   : > { %s1015_s23 = scalar_select %p882_p6, 1, 0 }
   0xe   : > { %p887_p8 = pnand %p555_p5, %p133_p7  ;;  %s807_s25 = smov [#allocation7]  }
   0xf   : > { %s146_s26 = sshll.u32 %s807_s25, 4  ;;  %s32_s28 = sadd.s32 1, %s801_s16  ;;  %s147_s26 = int_to_ptr.vmem [resolvable:$true] %s146_s26 }
  0x10   : > { %p595_p10 = pneg %p887_p8  ;;  %s41_s29 = sadd.s32 1, %s793_s14 }
  0x11   : > { %p34_p12 = scmp.ge.s32.totalorder %s32_s28, 2  ;;  %s678_s30 = scalar_lea.vmem %s147_s26, 32 }
  0x12   : > { %p896_p11 = pnand %p595_p10, %p867_p1  ;;  %p679_p0 = scmp.ne.s32.totalorder %s147_s26, %s678_s30 }
  0x13   : > { %p686_p7 = scmp.lt.s32.totalorder %s147_s26, %s147_s26  ;;  %p687_p6 = scmp.lt.s32.totalorder %s678_s30, %s678_s30 }
  0x14   : > { %p669_p13 = pneg %p896_p11 }
  0x15   : > { %p688_p9 = por %p687_p6, %p686_p7 }
  0x16   : > { %p681_p3 = pnand %p679_p0, %p669_p13 }
  0x18   : > { %p682_p5 = pneg %p681_p3 }
  0x1a   : > { %p689_p4 = pnand %p688_p9, %p682_p5 }
  0x1c   : > { %692 = shalt.err (!%p689_p4)
}
  0x1d   : > { %598 = dma.hbm_to_vmem [thread:$0]  (!%p896_p11), %s1008_s1, 32, %s147_s26, [#allocation8]  }
  0x1e   : > { %s1029_s28 = smov (%p34_p12, %s32_s28), 0  ;;  %p48_p6 = scmp.ne.s32.totalorder %s793_s14, %s789_s13 }
  0x1f   : > { %p49_p4 = scmp.eq.s32.totalorder %s805_s17, 0  ;;  %s36_s6 = ssub.s32 %s801_s16, %s1029_s28 }
  0x20   : > { %p608_p9 = scmp.lt.s32.totalorder %s805_s17, 2  ;;  %p39_p10 = scmp.eq.s32.totalorder %s36_s6, 0 }
  0x21   : > { %p50_p13 = por %p49_p4, %p48_p6  ;;  %p919_p0 = por %p871_p2, %p48_p6 }
  0x22   : > { %s160_s8 = sand.u32 1, %s793_s14   ;;  %s572_s11 = sshll.u32 %s801_s16, 7 }
  0x23   : > { %s925_s9 = scalar_select %p39_p10, %s793_s14, %s41_s29  }
  0x24   : > { %s558_s10 = sshll.u32 %s160_s8, 3  ;;  %s172_s25 = scalar_lea.hbm %s1007_s0, %s572_s11 }
  0x25   : > { %s164_s26 = scalar_lea.vmem [#allocation4], %s558_s10  ;;  %p931_p11 = pnand %p608_p9, %p50_p13 }
  0x26   : > { %s174_s27 = sshll.u32 %s164_s26, 4  ;;  %s161_s21 = scalar_lea.sflag [#allocation5], %s160_s8  ;;  %s175_s27 = int_to_ptr.vmem [resolvable:$true] %s174_s27 }
  0x27   : > { %p695_p2 = pneg %p931_p11  ;;  %s706_s4 = scalar_lea.vmem %s175_s27, 128 }
  0x28   : > { %p707_p12 = scmp.ne.s32.totalorder %s175_s27, %s706_s4  ;;  %s808_s29 = smov [#allocation4]  }
  0x29   : > { %s711_s5 = sshll.u32 %s808_s29, 4  ;;  %s712_s5 = int_to_ptr.vmem [resolvable:$false] %s711_s5 }
  0x2a   : > { %p709_p3 = pnand %p707_p12, %p695_p2  ;;  %s713_s6 = scalar_lea.vmem %s712_s5, 256 }
  0x2b   : > { %p714_p7 = scmp.lt.s32.totalorder %s175_s27, %s712_s5  ;;  %p715_p6 = scmp.lt.s32.totalorder %s713_s6, %s706_s4 }
  0x2c   : > { %p710_p5 = pneg %p709_p3 }
  0x2d   : > { %p716_p4 = por %p715_p6, %p714_p7 }
  0x2f   : > { %p717_p10 = pnand %p716_p4, %p710_p5 }
  0x31   : > { %720 = shalt.err (!%p717_p10)
}
  0x32   : > { %602 = dma.hbm_to_vmem [thread:$0]  (!%p931_p11), %s172_s25, 128, %s175_s27, %s161_s21  }
  0x33   : > { %183 = sbr.rel (%p887_p8) target bundleno = 795 (0x31b), region = 32  ;;  %s942_s8 = sand.u32 (!%p887_p8), 1, %s789_s13  }
  0x34   : > { %s562_s10 = sshll.u32 (!%p887_p8), %s942_s8, 3  ;;  %s186_s11 = scalar_lea.sflag (!%p887_p8), [#allocation5], %s942_s8 }
  0x35   : > { %s189_s18 = scalar_lea.vmem (!%p887_p8), [#allocation4], %s562_s10  ;;  %p1020_p9 = scmp.ne.s32.totalorder (!%p887_p8), %s1014_s22, 0 }
  0x38   : > { %772 = dma.done.wait (%p1020_p9), %s186_s11, 128  }
  0x39   : > { %774 = vsyncadd (%p1020_p9), %s186_s11, 4294967168 }
  0x3a   : > { %776 = dma.done.wait (%p867_p1), [#allocation8], 32  }
  0x3b   : > { %778 = vsyncadd (%p867_p1), [#allocation8], 4294967264  ;;  %v809_v0 = vmov 0.0   ;;  %v810_v1 = vmov -inf   ;;  %v222_v2 = vld [vmem:[%s189_s18] sm:$0xf] }
  0x3c   : > { %221 = vst [vmem:[#allocation3] sm:$0xf] %v809_v0  ;;  %220 = vst [vmem:[#allocation2] sm:$0xf] %v810_v1  ;;  %577 = vmatprep.subr.mxu0 %v809_v0  ;;  %582 = vmatprep.subr.mxu1 %v809_v0  ;;  %v229_v7 = vld [vmem:[%s189_s18 + $0x4] sm:$0xf] }
  0x3d   : > { %vm240_vm0 = vcmask 1043456   ;;  %vm811_vm1 = vmmov 0   ;;  %vm249_vm2 = vcmask 7168   ;;  %v251_v19 = vld [vmem:[#allocation7] sm:$0x3]  ;;  %vm252_vm3 = vcmask 31744  }
  0x3e   : > { %579 = vmatprep.mubr.msk.f32.mxu0 %vm811_vm1, %v809_v0  ;;  %584 = vmatprep.mubr.msk.f32.mxu1 %vm811_vm1, %v809_v0  ;;  %v362_v21 = vld [vmem:[%s1009_s2] sm:$0x3]  ;;  %vm367_vm4 = vcmask 1041408   ;;  %vm363_vm5 = vcmask 15360   ;;  %s569_s24 = sshll.u32 %s797_s15, 4  ;;  %s214_s19 = scalar_lea.vmem [#allocation9], %s942_s8 }
  0x3f   : > { %583 = vmatpush3.msk.msra.mxu1 %vm367_vm4, %v362_v21  ;;  %s466_s25 = sshll.u32 %s214_s19, 4  ;;  %vm451_vm6 = vcmask 24576   ;;  %s965_s30 = scalar_lea.hbm %s1010_s3, %s569_s24  ;;  %s467_s25 = int_to_ptr.vmem [resolvable:$true] %s466_s25 }
  0x40   : > { %s454_s21 = scalar_lea.sflag [#allocation6], %s942_s8  ;;  %s721_s4 = scalar_lea.vmem %s467_s25, 16 }
  0x41   : > { %p722_p1 = scmp.ne.s32.totalorder %s467_s25, %s721_s4  ;;  %s812_s29 = smov [#allocation9]  }
  0x42   : > { %s725_s5 = sshll.u32 %s812_s29, 4  ;;  %s726_s5 = int_to_ptr.vmem [resolvable:$false] %s725_s5 }
  0x43   : > { %v226_v3 = vld [vmem:[#allocation3] sm:$0xf]  ;;  %v223_v4 = vld [vmem:[#allocation2] sm:$0xf]  ;;  %p723_p8 = pnand %p722_p1, %p919_p0  ;;  %s727_s15 = scalar_lea.vmem %s726_s5, 32 }
  0x44   : > { %v227_v5 = vadd.f32 %v226_v3, %v222_v2  ;;  %v224_v6 = vmax.f32 %v223_v4, %v222_v2  ;;  %p728_p11 = scmp.lt.s32.totalorder %s467_s25, %s726_s5  ;;  %p729_p2 = scmp.lt.s32.totalorder %s727_s15, %s721_s4 }
  0x45   : > { %p724_p13 = pneg %p723_p8 }
  0x46   : > { %228 = vst [vmem:[#allocation3] sm:$0xf] %v227_v5  ;;  %225 = vst [vmem:[#allocation2] sm:$0xf] %v224_v6  ;;  %p730_p12 = por %p729_p2, %p728_p11 }
  0x48   : > { %p731_p3 = pnand %p730_p12, %p724_p13 }
  0x4d   : > { %v233_v8 = vld [vmem:[#allocation3] sm:$0xf]  ;;  %v230_v9 = vld [vmem:[#allocation2] sm:$0xf] }
  0x4e   : > { %v234_v10 = vadd.f32 %v233_v8, %v229_v7  ;;  %v231_v11 = vmax.f32 %v230_v9, %v229_v7 }
  0x50   : > { %235 = vst [vmem:[#allocation3] sm:$0xf] %v234_v10  ;;  %232 = vst [vmem:[#allocation2] sm:$0xf] %v231_v11 }
  0x57   : > { %v244_v12 = vld [vmem:[#allocation3] sm:$0xf]  ;;  %v239_v13 = vld [vmem:[#allocation2] sm:$0xf] }
  0x58   : > { %v245_v14 = vsel %vm240_vm0, %v244_v12, 0.0  ;;  %v241_v15 = vsel %vm240_vm0, %v239_v13, -inf }
  0x59   : > { %246 = vadd.xlane.f32.xlu0 %v245_v14 }
  0x5d   : > { %242 = vmax.xlane.f32.xlu0 %v241_v15 }
  0xe2   : > { %v247_v16 = vpop.xlane.xlu0 %246 }
  0xe3   : > { %v248_v17 = vmul.f32 0.00390625, %v247_v16 }
  0xe6   : > { %v243_v18 = vpop.xlane.xlu0 %242 }
  0xe7   : > { %v250_v20 = vsel %vm249_vm2, %v243_v18, %v248_v17 }
  0xe8   : > { %578 = vmatpush3.msk.msra.mxu0 %vm240_vm0, %v250_v20 }
  0xe9   : > { %580 = vmatmul.mubr.msk.f32.vlgmr.msra.gmra.mxu0 %vm252_vm3, %v251_v19 }
 0x1a9   : > { %v325_v22 = vpop.f32.mrf.mxu0 }
 0x1aa   : > { %v329_v23 = vmax.f32 %v325_v22, 0.0 }
 0x1ab   : > { %v581_v24 = vpop.f32.mrf.mxu0 }
 0x1ac   : > { %330 = vxpose.xlu1.b32.start.end [1/1] (short) (narrow) %v329_v23, 8 }
 0x228   : > { %v346_v25 = vpop.trf.xlu1 }
 0x229   : > { %585 = vmatmul.mubr.msk.f32.vlgmr.msra.gmra.mxu1 %vm363_vm5, %v346_v25 }
 0x2e9   : > { %v437_v26 = vpop.f32.mrf.mxu1 }
 0x2ea   : > { %v442_v27 = vrot.slane %v437_v26, 1 }
 0x2eb   : > { %v586_v28 = vpop.f32.mrf.mxu1 }
 0x2ec   : > { %v444_v29 = vadd.f32 %v442_v27, %v437_v26 }
 0x2ee   : > { %v568_v30 = vmul.f32 -1.442695, %v444_v29 }
 0x2f0   : > { %663 = vpow2.f32 %v568_v30 }
 0x2fd   : > { %v664_v31 = vpop.eup %663 }
 0x2fe   : > { %v448_v32 = vadd.f32 1.0, %v664_v31 }
 0x300   : > { %665 = vrcp.f32 %v448_v32 }
 0x30d   : > { %v666_v33 = vpop.eup %665 }
 0x30e   : > { %452 = vst.msk [vmem:[%s214_s19] sm:$0x1] %vm451_vm6, %v666_v33 }
 0x30f   : > { %734 = shalt.err (!%p731_p3)
}
 0x310   : > { %s735_s6 = scalar_lea.hbm %s965_s30, 16  ;;  %s739_s11 = scalar_lea.hbm %s1010_s3, 32 }
 0x311   : > { %p736_p5 = scmp.ne.s32.totalorder %s965_s30, %s735_s6  ;;  %p740_p4 = scmp.lt.s32.totalorder %s965_s30, %s1010_s3 }
 0x312   : > { %p741_p10 = scmp.lt.s32.totalorder %s739_s11, %s735_s6 }
 0x313   : > { %p737_p7 = pnand %p736_p5, %p919_p0 }
 0x314   : > { %p742_p9 = por %p741_p10, %p740_p4 }
 0x315   : > { %p738_p6 = pneg %p737_p7 }
 0x317   : > { %p743_p1 = pnand %p742_p9, %p738_p6 }
 0x319   : > { %746 = shalt.err (!%p743_p1)
}
 0x31a   : > { %593 = dma.vmem_to_hbm [thread:$0]  (%p919_p0), %s467_s25, 16, %s965_s30, %s454_s21  }
 0x31b PF: > { %s478_s22 = sand.u32 1, %s785_s12   ;;  %p1021_p8 = scmp.ne.s32.totalorder %s1015_s23, 0 }
 0x31c   : > { %p1022_p13 = scmp.ge.s32.totalorder %s805_s17, 2  ;;  %s479_s24 = scalar_lea.sflag [#allocation6], %s478_s22 }
 0x31e   : > { %p604_p11 = pnand %p1022_p13, %p1021_p8 }
 0x320   : > { %p605_p2 = pneg %p604_p11 }
 0x322   : > { %780 = dma.done.wait (%p605_p2), %s479_s24, 16  }
 0x323   : > { %782 = vsyncadd (%p605_p2), %s479_s24, 4294967280  ;;  %s20_s17 = sadd.s32 1, %s805_s17   ;;  %s1023_s12 = smov %s789_s13 }
 0x324   : > { %p17_p12 = scmp.ge.s32.totalorder %s20_s17, 4   ;;  %s1024_s13 = smov %s793_s14 }
 0x325   : > { %s1025_s14 = smov %s925_s9  ;;  %s1026_s15 = smov %s801_s16 }
 0x326   : > { %s1027_s16 = smov %s1029_s28  ;;  %19 = sbr.rel (!%p17_p12) target bundleno = 7 (0x7), region = 89 }
 0x32b   :  { %483 = vsyncpa [#allocation5], 1 }
 0x32c   :  { %485 = vsyncpa [#allocation5 + $0x1], 1 }
 0x32d   :  { %486 = vsyncpa [#allocation8], 1 }
 0x32e   :  { %487 = vsyncpa [#allocation6], 1 }
 0x32f   :  { %489 = vsyncpa [#allocation6 + $0x1], 1 }

</bundles_post_ra>
